<compile_context>
chip_gen: v7x
topology: tpu7x:2x2x1
jax: 0.10.0
libtpu: 0.0.40
codegen_flags: <defaults>
</compile_context>

<pallas_src>
import jax
import jax.numpy as jnp
from jax.experimental import pallas as pl
from jax.experimental.pallas import tpu as pltpu


def _round_up(n: int, m: int) -> int:
    return (n + m - 1) // m * m


def mlp_kernel(x_ref, w1_ref, b1_ref, w2_ref, b2_ref, w3_ref, b3_ref, o_ref):
    # Layer 1: Linear(81 -> 40) + ReLU.  bf16 operands, f32 accumulate (MXU).
    h = jnp.dot(x_ref[...], w1_ref[...], preferred_element_type=jnp.float32)
    h = jnp.maximum(h + b1_ref[...], 0.0)                    # f32 on the VPU
    # Layer 2: Linear(40 -> 21) + ReLU.  Re-cast activations for the MXU only.
    h = jnp.dot(h.astype(w2_ref.dtype), w2_ref[...],
                preferred_element_type=jnp.float32)
    h = jnp.maximum(h + b2_ref[...], 0.0)                    # (TILE_B, 21) f32
    # Layer 3: Linear(21 -> 1) + ReLU, off the MXU: VPU broadcast-multiply
    # against the (1, 21) weight row, then XLU lane reduce.
    y = jnp.sum(h * w3_ref[...], axis=-1, keepdims=True) + b3_ref[...]
    y = jnp.maximum(y, 0.0)                                  # (TILE_B, 1) f32
    # Lane-dense store: (TILE_B, 1) -> (1, 1, TILE_B) (sublane->lane via XLU).
    o_ref[...] = y.reshape(1, 1, -1).astype(o_ref.dtype)


def nnet_forward(x, params, *, tile_b=1024):
    """x: [B, 81] float32.  Returns [B, 1] float32."""
    w1, b1, w2, b2, w3, b3 = params
    B, F = x.shape

    # Lane-friendly batch tile: multiple of 128, clamped so tiny batches don't
    # over-pad and large tiles stay well inside VMEM on v5e/v6e/v7x
    # (bf16 x-tile at 1024 rows ~0.16 MiB; double-buffered << 32 MiB scoped).
    tile_b = max(128, min(_round_up(tile_b, 128), _round_up(B, 128)))
    padded_b = _round_up(B, tile_b)
    num_tiles = padded_b // tile_b
    if padded_b != B:
        x = jnp.pad(x, ((0, padded_b - B), (0, 0)))

    # bf16 only for the MXU streams; biases / layer-3 weights stay f32.
    xb = x.astype(jnp.bfloat16)
    w1b = w1.astype(jnp.bfloat16)
    w2b = w2.astype(jnp.bfloat16)

    flops = 2 * padded_b * (81 * 40 + 40 * 21 + 21)
    bytes_accessed = (xb.size * 2 + w1b.size * 2 + w2b.size * 2
                      + (b1.size + b2.size + w3.size + b3.size) * 4
                      + padded_b * 4)

    const = lambda a: pl.BlockSpec(a.shape, lambda i: (0,) * a.ndim)
    out = pl.pallas_call(
        mlp_kernel,
        out_shape=jax.ShapeDtypeStruct((num_tiles, 1, tile_b), jnp.float32),
        grid_spec=pltpu.PrefetchScalarGridSpec(
            num_scalar_prefetch=0,
            grid=(num_tiles,),
            in_specs=[
                pl.BlockSpec((tile_b, F), lambda i: (i, 0)),   # x: pipelined
                const(w1b), const(b1),                         # VMEM-resident
                const(w2b), const(b2),
                const(w3), const(b3),
            ],
            out_specs=pl.BlockSpec((1, 1, tile_b), lambda i: (i, 0, 0)),
        ),
        compiler_params=pltpu.CompilerParams(
            dimension_semantics=("parallel",)),   # megacore split on v7x
        cost_estimate=pl.CostEstimate(
            flops=flops, transcendentals=0, bytes_accessed=bytes_accessed),
    )(xb, w1b, b1, w2b, b2, w3, b3)

    # (num_tiles, 1, TILE_B) -> (padded_B, 1) -> (B, 1)
    return out.reshape(padded_b, 1)[:B]


def init_params(key):
    """Deterministic init matching PyTorch Linear shapes (stored transposed)."""
    def linear(key, fan_in, fan_out):
        kw, kb = jax.random.split(key)
        bound = 1.0 / jnp.sqrt(fan_in)
        w = jax.random.uniform(kw, (fan_in, fan_out), jnp.float32, -bound, bound)
        b = jax.random.uniform(kb, (1, fan_out), jnp.float32, -bound, bound)
        return w, b

    k1, k2, k3 = jax.random.split(key, 3)
    w1, b1 = linear(k1, 81, 40)
    w2, b2 = linear(k2, 40, 21)
    w3_col, b3 = linear(k3, 21, 1)
    # Layer-3 weight kept as a (1, 21) row vector: applied on the VPU, not MXU.
    return w1, b1, w2, b2, w3_col.T, b3


def reference_forward(x, params):
    w1, b1, w2, b2, w3, b3 = params
    h = jnp.maximum(x @ w1 + b1, 0.0)
    h = jnp.maximum(h @ w2 + b2, 0.0)
    return jnp.maximum(h @ w3.T + b3, 0.0)


if __name__ == "__main__":
    key = jax.random.PRNGKey(0)
    kx, kp = jax.random.split(key)

    B = 200  # small, but exercises padding and >1 pipelined grid step at tile_b=128
    x = jax.random.normal(kx, (B, 81), dtype=jnp.float32)
    params = init_params(kp)

    out = jax.block_until_ready(nnet_forward(x, params, tile_b=128))
    ref = reference_forward(x, params)

    assert out.shape == (B, 1), out.shape
    # bf16 MXU operands -> relaxed tolerance vs the pure-f32 reference.
    assert jnp.allclose(out, ref, atol=2e-2, rtol=2e-2), (
        float(jnp.max(jnp.abs(out - ref))))
    print("KERNEL_OK")
</pallas_src>

<mosaic_0001>
module attributes {stable_mosaic.version = 11 : i64} {
  func.func @mlp_kernel(%arg0: i32, %arg1: memref<128x81xbf16, #tpu.memory_space<vmem>>, %arg2: memref<81x40xbf16, #tpu.memory_space<vmem>>, %arg3: memref<1x40xf32, #tpu.memory_space<vmem>>, %arg4: memref<40x21xbf16, #tpu.memory_space<vmem>>, %arg5: memref<1x21xf32, #tpu.memory_space<vmem>>, %arg6: memref<1x21xf32, #tpu.memory_space<vmem>>, %arg7: memref<1x1xf32, #tpu.memory_space<vmem>>, %arg8: memref<1x1x128xf32, #tpu.memory_space<vmem>>) attributes {dimension_semantics = [#tpu.dimension_semantics<parallel>], iteration_bounds = array<i64: 2>, scalar_prefetch = 0 : i64, scratch_operands = 0 : i64, tpu.core_type = #tpu.core_type<tc>, window_params = [{transform_indices = @transform_0, window_bounds = array<i64: 128, 81>}, {pipeline_mode = #tpu.pipeline_mode<synchronous>, transform_indices = @transform_1, window_bounds = array<i64: 81, 40>}, {pipeline_mode = #tpu.pipeline_mode<synchronous>, transform_indices = @transform_2, window_bounds = array<i64: 1, 40>}, {pipeline_mode = #tpu.pipeline_mode<synchronous>, transform_indices = @transform_3, window_bounds = array<i64: 40, 21>}, {pipeline_mode = #tpu.pipeline_mode<synchronous>, transform_indices = @transform_4, window_bounds = array<i64: 1, 21>}, {pipeline_mode = #tpu.pipeline_mode<synchronous>, transform_indices = @transform_5, window_bounds = array<i64: 1, 21>}, {pipeline_mode = #tpu.pipeline_mode<synchronous>, transform_indices = @transform_6, window_bounds = array<i64: 1, 1>}, {transform_indices = @transform_7, window_bounds = array<i64: 1, 1, 128>}]} {
    %c0 = arith.constant 0 : index
    %c0_0 = arith.constant 0 : index
    %0 = vector.load %arg1[%c0, %c0_0] : memref<128x81xbf16, #tpu.memory_space<vmem>>, vector<128x81xbf16>
    %c0_1 = arith.constant 0 : index
    %c0_2 = arith.constant 0 : index
    %1 = vector.load %arg2[%c0_1, %c0_2] : memref<81x40xbf16, #tpu.memory_space<vmem>>, vector<81x40xbf16>
    %cst = arith.constant dense<0.000000e+00> : vector<128x40xf32>
    %2 = tpu.matmul %0, %1, %cst {dimension_numbers = #tpu.dot_dimension_numbers<[1], [0], [0], [1], [0, 0, 1, 1], [], []>} : vector<128x81xbf16>, vector<81x40xbf16>, vector<128x40xf32> -> vector<128x40xf32>
    %c0_3 = arith.constant 0 : index
    %c0_4 = arith.constant 0 : index
    %3 = vector.load %arg3[%c0_3, %c0_4] : memref<1x40xf32, #tpu.memory_space<vmem>>, vector<1x40xf32>
    %4 = vector.broadcast %3 : vector<1x40xf32> to vector<128x40xf32>
    %5 = arith.addf %2, %4 : vector<128x40xf32>
    %cst_5 = arith.constant 0.000000e+00 : f32
    %6 = vector.broadcast %cst_5 : f32 to vector<128x40xf32>
    %7 = arith.maximumf %5, %6 : vector<128x40xf32>
    %8 = arith.truncf %7 : vector<128x40xf32> to vector<128x40xbf16>
    %c0_6 = arith.constant 0 : index
    %c0_7 = arith.constant 0 : index
    %9 = vector.load %arg4[%c0_6, %c0_7] : memref<40x21xbf16, #tpu.memory_space<vmem>>, vector<40x21xbf16>
    %cst_8 = arith.constant dense<0.000000e+00> : vector<128x21xf32>
    %10 = tpu.matmul %8, %9, %cst_8 {dimension_numbers = #tpu.dot_dimension_numbers<[1], [0], [0], [1], [0, 0, 1, 1], [], []>} : vector<128x40xbf16>, vector<40x21xbf16>, vector<128x21xf32> -> vector<128x21xf32>
    %c0_9 = arith.constant 0 : index
    %c0_10 = arith.constant 0 : index
    %11 = vector.load %arg5[%c0_9, %c0_10] : memref<1x21xf32, #tpu.memory_space<vmem>>, vector<1x21xf32>
    %12 = vector.broadcast %11 : vector<1x21xf32> to vector<128x21xf32>
    %13 = arith.addf %10, %12 : vector<128x21xf32>
    %cst_11 = arith.constant 0.000000e+00 : f32
    %14 = vector.broadcast %cst_11 : f32 to vector<128x21xf32>
    %15 = arith.maximumf %13, %14 : vector<128x21xf32>
    %c0_12 = arith.constant 0 : index
    %c0_13 = arith.constant 0 : index
    %16 = vector.load %arg6[%c0_12, %c0_13] : memref<1x21xf32, #tpu.memory_space<vmem>>, vector<1x21xf32>
    %17 = vector.broadcast %16 : vector<1x21xf32> to vector<128x21xf32>
    %18 = arith.mulf %15, %17 : vector<128x21xf32>
    %cst_14 = arith.constant dense<0.000000e+00> : vector<128xf32>
    %19 = vector.multi_reduction <add>, %18, %cst_14 [1] : vector<128x21xf32> to vector<128xf32>
    %20 = vector.shape_cast %19 : vector<128xf32> to vector<128x1xf32>
    %c0_15 = arith.constant 0 : index
    %c0_16 = arith.constant 0 : index
    %21 = vector.load %arg7[%c0_15, %c0_16] : memref<1x1xf32, #tpu.memory_space<vmem>>, vector<1x1xf32>
    %22 = vector.broadcast %21 : vector<1x1xf32> to vector<128x1xf32>
    %23 = arith.addf %20, %22 : vector<128x1xf32>
    %cst_17 = arith.constant 0.000000e+00 : f32
    %24 = vector.broadcast %cst_17 : f32 to vector<128x1xf32>
    %25 = arith.maximumf %23, %24 : vector<128x1xf32>
    %26 = vector.shape_cast %25 : vector<128x1xf32> to vector<1x1x128xf32>
    %c0_18 = arith.constant 0 : index
    %c0_19 = arith.constant 0 : index
    %c0_20 = arith.constant 0 : index
    %27 = vector.load %arg8[%c0_18, %c0_19, %c0_20] : memref<1x1x128xf32, #tpu.memory_space<vmem>>, vector<1x1x128xf32>
    tpu.vector_store %arg8[%c0_18, %c0_19, %c0_20], %26 {strides = array<i32>} : memref<1x1x128xf32, #tpu.memory_space<vmem>>, vector<1x1x128xf32>,
    return
  }
  func.func @transform_0(%arg0: i32) -> (i32, i32) {
    %c0_i32 = arith.constant 0 : i32
    %c0_i32_0 = arith.constant 0 : i32
    return %arg0, %c0_i32 : i32, i32
  }
  func.func @transform_1(%arg0: i32) -> (i32, i32) {
    %c0_i32 = arith.constant 0 : i32
    %c0_i32_0 = arith.constant 0 : i32
    %c0_i32_1 = arith.constant 0 : i32
    return %c0_i32, %c0_i32_0 : i32, i32
  }
  func.func @transform_2(%arg0: i32) -> (i32, i32) {
    %c0_i32 = arith.constant 0 : i32
    %c0_i32_0 = arith.constant 0 : i32
    %c0_i32_1 = arith.constant 0 : i32
    return %c0_i32, %c0_i32_0 : i32, i32
  }
  func.func @transform_3(%arg0: i32) -> (i32, i32) {
    %c0_i32 = arith.constant 0 : i32
    %c0_i32_0 = arith.constant 0 : i32
    %c0_i32_1 = arith.constant 0 : i32
    return %c0_i32, %c0_i32_0 : i32, i32
  }
  func.func @transform_4(%arg0: i32) -> (i32, i32) {
    %c0_i32 = arith.constant 0 : i32
    %c0_i32_0 = arith.constant 0 : i32
    %c0_i32_1 = arith.constant 0 : i32
    return %c0_i32, %c0_i32_0 : i32, i32
  }
  func.func @transform_5(%arg0: i32) -> (i32, i32) {
    %c0_i32 = arith.constant 0 : i32
    %c0_i32_0 = arith.constant 0 : i32
    %c0_i32_1 = arith.constant 0 : i32
    return %c0_i32, %c0_i32_0 : i32, i32
  }
  func.func @transform_6(%arg0: i32) -> (i32, i32) {
    %c0_i32 = arith.constant 0 : i32
    %c0_i32_0 = arith.constant 0 : i32
    %c0_i32_1 = arith.constant 0 : i32
    return %c0_i32, %c0_i32_0 : i32, i32
  }
  func.func @transform_7(%arg0: i32) -> (i32, i32, i32) {
    %c0_i32 = arith.constant 0 : i32
    %c0_i32_0 = arith.constant 0 : i32
    %c0_i32_1 = arith.constant 0 : i32
    return %arg0, %c0_i32, %c0_i32_0 : i32, i32, i32
  }
}

</mosaic_0001>

<bundles_post_ra>
// kernel: tpu_custom_call.1
= control target key start
LH: loop header
LB: loop body
LE: loop exit
PB: predicated region body
PF: predicated region fallthrough
CT: control target
= control target key end

     0   :  { %s1598_s0 = inlined_call_operand.vmem [shape: bf16[256,81], index: 0, kind: input, shape index: {}]   ;;  %s1599_s1 = inlined_call_operand.vmem [shape: bf16[81,40], index: 1, kind: input, shape index: {}]   ;;  %s1600_s2 = inlined_call_operand.vmem [shape: f32[1,40], index: 2, kind: input, shape index: {}]   ;;  %s1601_s3 = inlined_call_operand.vmem [shape: bf16[40,21], index: 3, kind: input, shape index: {}]   ;;  %s1602_s4 = inlined_call_operand.vmem [shape: f32[1,21], index: 4, kind: input, shape index: {}]   ;;  %s1603_s5 = inlined_call_operand.vmem [shape: f32[1,21], index: 5, kind: input, shape index: {}]   ;;  %s1604_s6 = inlined_call_operand.<no memory space> [shape: f32[1,1], index: 6, kind: input, shape index: {}]   ;;  %s1605_s7 = inlined_call_operand.hbm [shape: f32[2,1,128], index: 7, kind: output, shape index: {}]  }
   0x1   :  { %v12_v0 = vstv %s1604_s6 }
   0x2   :  { %13 = vst [vmem:[#allocation2] sm:$0x1] %v12_v0 }
   0x3   :  { %14 = vsyncpa [#allocation4], 0 }
   0x4   :  { %16 = vsyncpa [#allocation4 + $0x1], 0  ;;  %s1355_s26 = smov 0   ;;  %s1357_s27 = smov 0  }
   0x5   :  { %s1359_s28 = smov 0   ;;  %s1361_s29 = smov 0  }
   0x6 LB: > { %s1064_s6 = sadd.s32 4294967295, %s1308_s29   ;;  %s1065_s30 = sadd.s32 4294967294, %s1308_s29   ;;  %s1308_s29 = sphi %s1361_s29, %s1611_s29   ;;  %s1304_s28 = sphi %s1359_s28, %s1610_s28   ;;  %s1300_s27 = sphi %s1357_s27, %s1609_s27   ;;  %s1296_s26 = sphi %s1355_s26, %s1608_s26  }
   0x7   : > { %s1378_s8 = sadd.s32 1, %s1308_s29   ;;  %s181_s9 = sadd.s32 1, %s1304_s28 }
   0x8   : > { %s178_s10 = ssub.s32 %s1308_s29, %s1378_s8  ;;  %p191_p0 = scmp.ne.s32.totalorder %s1304_s28, %s1300_s27 }
   0x9   : > { %p179_p1 = scmp.eq.s32.totalorder %s178_s10, 0  ;;  %p192_p2 = scmp.eq.s32.totalorder %s1064_s6, 1 }
   0xa   : > { %p197_p3 = scmp.ne.s32.totalorder %s1300_s27, %s1296_s26  ;;  %p198_p4 = scmp.eq.s32.totalorder %s1065_s30, 1 }
   0xb   : > { %s1388_s11 = scalar_select %p179_p1, %s1304_s28, %s181_s9  }
   0xc   : > { %p1390_p5 = por %p192_p2, %p191_p0  ;;  %p1394_p6 = por %p198_p4, %p197_p3 }
   0xd   : > { %p1068_p7 = scmp.ge.s32.totalorder %s1308_s29, 1  ;;  %p243_p8 = scmp.lt.s32.totalorder %s1308_s29, 3 }
   0xf   : > { %p244_p9 = pnand %p1068_p7, %p243_p8 }
  0x10   : > { %v1229_v1 = vld [vmem:[%s1599_s1] sm:$0xff] (!%p244_p9)   ;;  %v1230_v2 = vld [vmem:[%s1599_s1 + $0x8] sm:$0xff] (!%p244_p9)   ;;  %v1310_v3 = vmov (!%p244_p9), 0   ;;  %s1406_s18 = sshll.u32 (!%p244_p9), %s1064_s6, 4  ;;  %v1231_v4 = vld [vmem:[%s1599_s1 + $0x10] sm:$0xff] (!%p244_p9)   ;;  %vm388_vm0 = vcmask (!%p244_p9), 662528  }
  0x11   : > { %247 = sbr.rel (%p244_p9) target bundleno = 814 (0x32e), region = 48  ;;  %1136 = vmatprep.subr.bf16.mxu0 (!%p244_p9), %v1229_v1  ;;  %1227 = vset.pattern.permute.xlu1 (!%p244_p9), %v1310_v3  ;;  %p275_p10 = scmp.lt.s32.totalorder (!%p244_p9), %s1406_s18, 31  ;;  %v1243_v5 = vld [vmem:[%s1601_s3] sm:$0xff] (!%p244_p9)   ;;  %v1232_v6 = vld [vmem:[%s1599_s1 + $0x18] sm:$0xff] (!%p244_p9)   ;;  %vm413_vm1 = vcmask (!%p244_p9), 1040384   ;;  %v1244_v19 = vld [vmem:[%s1601_s3 + $0x8] sm:$0xff] (!%p244_p9)  }
  0x12   : > { %1137 = vmatpush3.bf16.msra.mxu0 (!%p244_p9), %v1229_v1  ;;  %1228 = vset.pattern.permute.xlu0 (!%p244_p9), %v1310_v3  ;;  %v1234_v7 = vld [vmem:[%s1599_s1 + $0x28] ss:$0 sps:$4 sm:$0x11] (!%p244_p9)   ;;  %v1233_v9 = vld [vmem:[%s1599_s1 + $0x20] sm:$0xff] (!%p244_p9)   ;;  %v415_v10 = vsel (!%p244_p9), %vm413_vm1, 65535, %v1310_v3  ;;  %vm592_vm2 = vcmask (!%p244_p9), 1043456   ;;  %s1554_s19 = scalar_lea.hbm (!%p244_p9), %s1605_s7, %s1406_s18 }
  0x13   : > { %1138 = vmatprep.subr.bf16.mxu0 (!%p244_p9), %v1230_v2  ;;  %1164 = vmatprep.subr.bf16.mxu1 (!%p244_p9), %v1243_v5  ;;  %v417_v11 = vand.u32 (!%p244_p9), %v1234_v7, %v415_v10  ;;  %v1245_v20 = vld [vmem:[%s1601_s3 + $0x10] ss:$0 sps:$4 sm:$0xff] (!%p244_p9)   ;;  %v1071_v22 = vld [vmem:[%s1600_s2] ss:$0 sm:$0xff] (!%p244_p9)  ;;  %vm567_vm3 = vcmask (!%p244_p9), 326656   ;;  %vm732_vm4 = vcmask (!%p244_p9), 171008  }
  0x14   : > { %1165 = vmatpush3.bf16.msra.mxu1 (!%p244_p9), %v1243_v5  ;;  %v594_v21 = vsel (!%p244_p9), %vm592_vm2, %v1245_v20, 0  ;;  %vm895_vm5 = vcmask (!%p244_p9), 130112   ;;  %vm902_vm6 = vcmask (!%p244_p9), 195712   ;;  %vm909_vm7 = vcmask (!%p244_p9), 261312   ;;  %s1311_s22 = smov (!%p244_p9), [#allocation3]  }
  0x15   : > { %1166 = vmatprep.subr.bf16.mxu1 (!%p244_p9), %v1244_v19  ;;  %vm916_vm8 = vcmask (!%p244_p9), 326912   ;;  %vm923_vm9 = vcmask (!%p244_p9), 392512   ;;  %vm930_vm10 = vcmask (!%p244_p9), 458112   ;;  %vm937_vm11 = vcmask (!%p244_p9), 523712   ;;  %s1250_s23 = sshll.u32 (!%p244_p9), %s1311_s22, 4  ;;  %s1251_s23 = int_to_ptr.vmem [resolvable:$false] %s1250_s23 }
  0x16   : > { %1139 = vmatpush3.bf16.msra.mxu0 (!%p244_p9), %v1230_v2  ;;  %vm944_vm12 = vcmask (!%p244_p9), 589312   ;;  %vm951_vm13 = vcmask (!%p244_p9), 654912   ;;  %vm958_vm14 = vcmask (!%p244_p9), 720512   ;;  %vm965_vm15 = vcmask (!%p244_p9), 786112   ;;  %s1252_s24 = scalar_lea.vmem (!%p244_p9), %s1251_s23, 32 }
  0x17   : > { %1140 = vmatprep.subr.bf16.mxu0 (!%p244_p9), %v1231_v4  ;;  %vm979_vm1 = vcmask (!%p244_p9), 917312  }
  0x18   : > { %s276_s21 = scalar_select %p275_p10, %s1406_s18, 31  ;;  %1167 = vmatpush3.bf16.msra.mxu1 %v1244_v19 }
  0x19   : > { %1186 = vmatprep.subr.msk.bf16.mxu1 %vm592_vm2, %v1245_v20  ;;  %vm986_vm2 = vcmask 982912  }
  0x1a   : > { %s1070_s6 = sshll.u32 %s276_s21, 2  ;;  %1141 = vmatpush3.bf16.msra.mxu0 %v1231_v4 }
  0x1b   : > { %s278_s10 = scalar_lea.vmem %s1598_s0, %s1070_s6  ;;  %1142 = vmatprep.subr.bf16.mxu0 %v1232_v6 }
  0x1c   : > { %v1235_v8 = vld [vmem:[%s278_s10] sm:$0xff]   ;;  %v1236_v12 = vld [vmem:[%s278_s10 + $0x8] sm:$0xff]   ;;  %v1237_v13 = vld [vmem:[%s278_s10 + $0x10] sm:$0xff]   ;;  %1169 = vmatpush3.bf16.msra.mxu1 %v594_v21 }
  0x1d   : > { %1148 = vmatprep.mubr.msk.bf16.mxu0 %vm388_vm0, %v1235_v8  ;;  %v1238_v14 = vld [vmem:[%s278_s10 + $0x18] sm:$0xff]   ;;  %v1239_v15 = vld [vmem:[%s278_s10 + $0x20] sm:$0xff]   ;;  %v1240_v16 = vld [vmem:[%s278_s10 + $0x28] sm:$0xff]  }
  0x1e   : > { %1143 = vmatpush3.bf16.msra.mxu0 %v1232_v6  ;;  %v1241_v17 = vld [vmem:[%s278_s10 + $0x30] sm:$0xff]   ;;  %v1242_v18 = vld [vmem:[%s278_s10 + $0x38] sm:$0xff]   ;;  %v1463_v21 = vld [vmem:[%s1603_s5] ss:$0 sm:$0xff]  ;;  %s272_s10 = sand.u32 1, %s1300_s27  }
  0x1f   : > { %1144 = vmatprep.subr.bf16.mxu0 %v1233_v9  ;;  %s273_s14 = scalar_lea.vmem [#allocation3], %s272_s10  ;;  %s998_s20 = scalar_lea.sflag [#allocation4], %s272_s10 }
  0x20   : > { %s1010_s15 = sshll.u32 %s273_s14, 4  ;;  %s1556_s15 = int_to_ptr.vmem [resolvable:$true] %s1010_s15 }
  0x21   : > { %s1246_s21 = scalar_lea.vmem %s1556_s15, 16  ;;  %p1253_p0 = scmp.lt.s32.totalorder %s1556_s15, %s1251_s23 }
  0x22   : > { %1145 = vmatpush3.bf16.msra.mxu0 %v1233_v9  ;;  %p1247_p11 = scmp.ne.s32.totalorder %s1556_s15, %s1246_s21  ;;  %p1254_p1 = scmp.lt.s32.totalorder %s1252_s24, %s1246_s21 }
  0x23   : > { %1146 = vmatprep.subr.bf16.mxu0 %v417_v11 }
  0x24   : > { %p1248_p12 = pnand %p1247_p11, %p1390_p5  ;;  %p1255_p2 = por %p1254_p1, %p1253_p0 }
  0x26   : > { %1147 = vmatpush3.bf16.msra.mxu0 %v417_v11  ;;  %p1249_p13 = pneg %p1248_p12 }
  0x28   : > { %p1256_p3 = pnand %p1255_p2, %p1249_p13 }
  0x29   : > { %1149 = vmatmul.mubr.msk.bf16.vlgmr.msra.gmra.mrb[0].mxu0 %vm388_vm0, %v1236_v12 }
  0x2a   : > { %1152 = vmatprep.mubr.msk.bf16.mxu0 %vm388_vm0, %v1237_v13 }
  0x31   : > { %1153 = vmatmul.mubr.msk.bf16.gmra.mrb[4].mxu0 %vm388_vm0, %v1238_v14 }
  0x32   : > { %1156 = vmatprep.mubr.msk.bf16.mxu0 %vm388_vm0, %v1239_v15  ;;  %v1456_v15 = vld [vmem:[%s1602_s4] ss:$0 sm:$0xff] }
  0x39   : > { %1157 = vmatmul.mubr.msk.bf16.gmra.mrb[8].mxu0 %vm388_vm0, %v1240_v16 }
  0x3a   : > { %1160 = vmatprep.mubr.msk.bf16.mxu0 %vm388_vm0, %v1241_v17 }
  0x41   : > { %1161 = vmatmul.mubr.msk.bf16.gmra.mrb[12].mxu0 %vm388_vm0, %v1242_v18  ;;  %vm972_vm0 = vcmask 851712  }
  0xfc   : > { %v1150_v23 = vpop.f32.mrb[0].mxu0 }
  0xfd   : > { %v462_v24 = vadd.f32 %v1150_v23, %v1071_v22  ;;  %v453_v25 = vpop.f32.mrb[1].mxu0 }
  0xfe   : > { %v454_v26 = vadd.f32 %v1071_v22, %v453_v25  ;;  %v1151_v27 = vpop.f32.mrb[2].mxu0 }
  0xff   : > { %v465_v28 = vadd.f32 %v1151_v27, %v1071_v22  ;;  %v456_v29 = vpop.f32.mrb[3].mxu0  ;;  %v518_v31 = vmax.f32 %v462_v24, 0.0 }
 0x100   : > { %v457_v30 = vadd.f32 %v1071_v22, %v456_v29  ;;  %v516_v33 = vmax.f32 %v454_v26, 0.0 }
 0x101   : > { %v519_v32 = vmax.f32 %v465_v28, 0.0 }
 0x102   : > { %v517_v34 = vmax.f32 %v457_v30, 0.0 }
 0x103   : > { %v533_v35 = vpack.c.bf16 %v519_v32, %v518_v31 }
 0x104   : > { %v1154_v36 = vpop.f32.mrb[4].mxu0  ;;  %v532_v37 = vpack.c.bf16 %v517_v34, %v516_v33 }
 0x105   : > { %v478_v38 = vadd.f32 %v1154_v36, %v1071_v22  ;;  %v469_v39 = vpop.f32.mrb[5].mxu0 }
 0x106   : > { %v470_v40 = vadd.f32 %v1071_v22, %v469_v39  ;;  %v1155_v41 = vpop.f32.mrb[6].mxu0  ;;  %1170 = vmatprep.mubr.msk.bf16.mxu1 %vm567_vm3, %v532_v37 }
 0x107   : > { %v522_v42 = vmax.f32 %v478_v38, 0.0  ;;  %v481_v43 = vadd.f32 %v1155_v41, %v1071_v22  ;;  %v472_v44 = vpop.f32.mrb[7].mxu0  ;;  %1171 = vmatmul.mubr.msk.bf16.vlgmr.msra.gmra.mrb[0].mxu1 %vm567_vm3, %v533_v35 }
 0x108   : > { %v520_v45 = vmax.f32 %v470_v40, 0.0  ;;  %v473_v46 = vadd.f32 %v1071_v22, %v472_v44 }
 0x109   : > { %v523_v47 = vmax.f32 %v481_v43, 0.0 }
 0x10a   : > { %v521_v48 = vmax.f32 %v473_v46, 0.0 }
 0x10b   : > { %v535_v49 = vpack.c.bf16 %v523_v47, %v522_v42 }
 0x10c   : > { %v534_v50 = vpack.c.bf16 %v521_v48, %v520_v45  ;;  %v1158_v51 = vpop.f32.mrb[8].mxu0 }
 0x10d   : > { %v494_v52 = vadd.f32 %v1158_v51, %v1071_v22  ;;  %v485_v53 = vpop.f32.mrb[9].mxu0 }
 0x10e   : > { %v486_v54 = vadd.f32 %v1071_v22, %v485_v53  ;;  %v1159_v55 = vpop.f32.mrb[10].mxu0  ;;  %1174 = vmatprep.mubr.msk.bf16.mxu1 %vm567_vm3, %v534_v50 }
 0x10f   : > { %v526_v56 = vmax.f32 %v494_v52, 0.0  ;;  %v497_v57 = vadd.f32 %v1159_v55, %v1071_v22  ;;  %v488_v58 = vpop.f32.mrb[11].mxu0  ;;  %1175 = vmatmul.mubr.msk.bf16.gmra.mrb[4].mxu1 %vm567_vm3, %v535_v49 }
 0x110   : > { %v524_v59 = vmax.f32 %v486_v54, 0.0  ;;  %v489_v60 = vadd.f32 %v1071_v22, %v488_v58 }
 0x111   : > { %v527_v61 = vmax.f32 %v497_v57, 0.0 }
 0x112   : > { %v525_v62 = vmax.f32 %v489_v60, 0.0 }
 0x113   : > { %v537_v63 = vpack.c.bf16 %v527_v61, %v526_v56 }
 0x114   : > { %v536_v0 = vpack.c.bf16 %v525_v62, %v524_v59  ;;  %v1162_v1 = vpop.f32.mrb[12].mxu0 }
 0x115   : > { %v510_v2 = vadd.f32 %v1162_v1, %v1071_v22  ;;  %v501_v3 = vpop.f32.mrb[13].mxu0 }
 0x116   : > { %v502_v4 = vadd.f32 %v1071_v22, %v501_v3  ;;  %v1163_v5 = vpop.f32.mrb[14].mxu0  ;;  %1178 = vmatprep.mubr.msk.bf16.mxu1 %vm567_vm3, %v536_v0 }
 0x117   : > { %v530_v6 = vmax.f32 %v510_v2, 0.0  ;;  %v513_v7 = vadd.f32 %v1163_v5, %v1071_v22  ;;  %v504_v8 = vpop.f32.mrb[15].mxu0  ;;  %1179 = vmatmul.mubr.msk.bf16.gmra.mrb[8].mxu1 %vm567_vm3, %v537_v63 }
 0x118   : > { %v528_v9 = vmax.f32 %v502_v4, 0.0  ;;  %v505_v10 = vadd.f32 %v1071_v22, %v504_v8 }
 0x119   : > { %v531_v11 = vmax.f32 %v513_v7, 0.0 }
 0x11a   : > { %v529_v12 = vmax.f32 %v505_v10, 0.0 }
 0x11b   : > { %v539_v13 = vpack.c.bf16 %v531_v11, %v530_v6 }
 0x11c   : > { %v538_v14 = vpack.c.bf16 %v529_v12, %v528_v9 }
 0x11e   : > { %1182 = vmatprep.mubr.msk.bf16.mxu1 %vm567_vm3, %v538_v14 }
 0x11f   : > { %1183 = vmatmul.mubr.msk.bf16.gmra.mrb[12].mxu1 %vm567_vm3, %v539_v13  ;;  %vm993_vm3 = vcmask 1048512  }
 0x1da   : > { %v1172_v16 = vpop.f32.mrb[0].mxu1 }
 0x1db   : > { %v639_v17 = vadd.f32 %v1172_v16, %v1456_v15  ;;  %v630_v18 = vpop.f32.mrb[1].mxu1 }
 0x1dc   : > { %v631_v19 = vadd.f32 %v1456_v15, %v630_v18  ;;  %v1173_v20 = vpop.f32.mrb[2].mxu1 }
 0x1dd   : > { %v695_v22 = vmax.f32 %v639_v17, 0.0  ;;  %v642_v23 = vadd.f32 %v1173_v20, %v1456_v15  ;;  %v633_v24 = vpop.f32.mrb[3].mxu1 }
 0x1de   : > { %v693_v25 = vmax.f32 %v631_v19, 0.0  ;;  %v634_v26 = vadd.f32 %v1456_v15, %v633_v24 }
 0x1df   : > { %v696_v27 = vmax.f32 %v642_v23, 0.0  ;;  %v718_v28 = vmul.f32 %v1463_v21, %v695_v22 }
 0x1e0   : > { %v694_v29 = vmax.f32 %v634_v26, 0.0  ;;  %v716_v30 = vmul.f32 %v1463_v21, %v693_v25 }
 0x1e1   : > { %v739_v31 = vsel %vm732_vm4, %v718_v28, 0.0  ;;  %v719_v32 = vmul.f32 %v1463_v21, %v696_v27 }
 0x1e2   : > { %740 = vadd.xlane.f32.xlu1 %v739_v31  ;;  %v1176_v33 = vpop.f32.mrb[4].mxu1  ;;  %v733_v34 = vsel %vm732_vm4, %v716_v30, 0.0  ;;  %v717_v35 = vmul.f32 %v1463_v21, %v694_v29 }
 0x1e3   : > { %v655_v36 = vadd.f32 %v1176_v33, %v1456_v15  ;;  %v646_v37 = vpop.f32.mrb[5].mxu1  ;;  %734 = vadd.xlane.f32.xlu0 %v733_v34  ;;  %v742_v43 = vsel %vm732_vm4, %v719_v32, 0.0  ;;  %v1107_v34 = vld [vmem:[#allocation2] ss:$0 sm:$0xff] }
 0x1e4   : > { %v647_v38 = vadd.f32 %v1456_v15, %v646_v37  ;;  %v1177_v39 = vpop.f32.mrb[6].mxu1  ;;  %v736_v46 = vsel %vm732_vm4, %v717_v35, 0.0 }
 0x1e5   : > { %v699_v40 = vmax.f32 %v655_v36, 0.0  ;;  %v658_v41 = vadd.f32 %v1177_v39, %v1456_v15  ;;  %v649_v42 = vpop.f32.mrb[7].mxu1 }
 0x1e6   : > { %v697_v44 = vmax.f32 %v647_v38, 0.0  ;;  %v650_v45 = vadd.f32 %v1456_v15, %v649_v42  ;;  %743 = vadd.xlane.f32.xlu1 %v742_v43 }
 0x1e7   : > { %v700_v47 = vmax.f32 %v658_v41, 0.0  ;;  %737 = vadd.xlane.f32.xlu0 %v736_v46  ;;  %v722_v48 = vmul.f32 %v1463_v21, %v699_v40 }
 0x1e8   : > { %v698_v49 = vmax.f32 %v650_v45, 0.0  ;;  %v720_v53 = vmul.f32 %v1463_v21, %v697_v44 }
 0x1e9   : > { %v751_v50 = vsel %vm732_vm4, %v722_v48, 0.0  ;;  %v723_v51 = vmul.f32 %v1463_v21, %v700_v47 }
 0x1ea   : > { %v1180_v52 = vpop.f32.mrb[8].mxu1  ;;  %v721_v57 = vmul.f32 %v1463_v21, %v698_v49  ;;  %v745_v0 = vsel %vm732_vm4, %v720_v53, 0.0 }
 0x1eb   : > { %v671_v54 = vadd.f32 %v1180_v52, %v1456_v15  ;;  %v662_v55 = vpop.f32.mrb[9].mxu1  ;;  %752 = vadd.xlane.f32.xlu0 %v751_v50  ;;  %v754_v56 = vsel %vm732_vm4, %v723_v51, 0.0 }
 0x1ec   : > { %v663_v58 = vadd.f32 %v1456_v15, %v662_v55  ;;  %755 = vadd.xlane.f32.xlu1 %v754_v56  ;;  %v1181_v59 = vpop.f32.mrb[10].mxu1  ;;  %v748_v3 = vsel %vm732_vm4, %v721_v57, 0.0 }
 0x1ed   : > { %v703_v60 = vmax.f32 %v671_v54, 0.0  ;;  %v674_v61 = vadd.f32 %v1181_v59, %v1456_v15  ;;  %v665_v62 = vpop.f32.mrb[11].mxu1 }
 0x1ee   : > { %v701_v63 = vmax.f32 %v663_v58, 0.0  ;;  %v666_v1 = vadd.f32 %v1456_v15, %v665_v62 }
 0x1ef   : > { %v704_v2 = vmax.f32 %v674_v61, 0.0  ;;  %746 = vadd.xlane.f32.xlu0 %v745_v0  ;;  %v726_v4 = vmul.f32 %v1463_v21, %v703_v60 }
 0x1f0   : > { %v702_v5 = vmax.f32 %v666_v1, 0.0  ;;  %749 = vadd.xlane.f32.xlu1 %v748_v3  ;;  %v724_v6 = vmul.f32 %v1463_v21, %v701_v63 }
 0x1f1   : > { %v727_v7 = vmul.f32 %v1463_v21, %v704_v2  ;;  %v763_v8 = vsel %vm732_vm4, %v726_v4, 0.0 }
 0x1f2   : > { %v1184_v9 = vpop.f32.mrb[12].mxu1  ;;  %v725_v10 = vmul.f32 %v1463_v21, %v702_v5  ;;  %v757_v17 = vsel %vm732_vm4, %v724_v6, 0.0 }
 0x1f3   : > { %v687_v11 = vadd.f32 %v1184_v9, %v1456_v15  ;;  %v678_v12 = vpop.f32.mrb[13].mxu1  ;;  %v766_v13 = vsel %vm732_vm4, %v727_v7, 0.0  ;;  %764 = vadd.xlane.f32.xlu0 %v763_v8 }
 0x1f4   : > { %v679_v14 = vadd.f32 %v1456_v15, %v678_v12  ;;  %v1185_v16 = vpop.f32.mrb[14].mxu1  ;;  %767 = vadd.xlane.f32.xlu1 %v766_v13  ;;  %v760_v22 = vsel %vm732_vm4, %v725_v10, 0.0 }
 0x1f5   : > { %v707_v18 = vmax.f32 %v687_v11, 0.0  ;;  %v690_v19 = vadd.f32 %v1185_v16, %v1456_v15  ;;  %v681_v20 = vpop.f32.mrb[15].mxu1 }
 0x1f6   : > { %v705_v23 = vmax.f32 %v679_v14, 0.0  ;;  %v682_v24 = vadd.f32 %v1456_v15, %v681_v20  ;;  %v884_v20 = vlaneseq }
 0x1f7   : > { %v708_v25 = vmax.f32 %v690_v19, 0.0  ;;  %758 = vadd.xlane.f32.xlu0 %v757_v17  ;;  %v730_v28 = vmul.f32 %v1463_v21, %v707_v18 }
 0x1f8   : > { %v706_v26 = vmax.f32 %v682_v24, 0.0  ;;  %761 = vadd.xlane.f32.xlu1 %v760_v22  ;;  %v728_v27 = vmul.f32 %v1463_v21, %v705_v23  ;;  %v1511_v23 = vand.u32 127, %v884_v20 }
 0x1f9   : > { %v731_v31 = vmul.f32 %v1463_v21, %v708_v25  ;;  %v775_v33 = vsel %vm732_vm4, %v730_v28, 0.0 }
 0x1fa   : > { %v769_v29 = vsel %vm732_vm4, %v728_v27, 0.0  ;;  %v729_v30 = vmul.f32 %v1463_v21, %v706_v26  ;;  %v890_v24 = vadd.s32 4294967288, %v1511_v23  ;;  %v1514_v26 = vshrl.u32 %v884_v20, 7 }
 0x1fb   : > { %770 = vadd.xlane.f32.xlu0 %v769_v29  ;;  %v778_v15 = vsel %vm732_vm4, %v731_v31, 0.0  ;;  %v897_v29 = vadd.s32 4294967280, %v1511_v23 }
 0x1fc   : > { %v772_v32 = vsel %vm732_vm4, %v729_v30, 0.0  ;;  %v893_v27 = vsub.s32 %v890_v24, %v1514_v26  ;;  %v888_v30 = vsub.s32 %v1511_v23, %v1514_v26 }
 0x1fd   : > { %773 = vadd.xlane.f32.xlu1 %v772_v32  ;;  %v911_v32 = vadd.s32 4294967264, %v1511_v23 }
 0x1ff   : > { %776 = vadd.xlane.f32.xlu0 %v775_v33  ;;  %v904_v33 = vadd.s32 4294967272, %v1511_v23 }
 0x201   : > { %779 = vadd.xlane.f32.xlu1 %v778_v15 }
 0x26f   : > { %v741_v35 = vpop.xlane.xlu1 %740 }
 0x270   : > { %v790_v36 = vadd.f32 %v1107_v34, %v741_v35  ;;  %v735_v37 = vpop.xlane.xlu0 %734  ;;  %v900_v35 = vsub.s32 %v897_v29, %v1514_v26 }
 0x271   : > { %v788_v38 = vadd.f32 %v1107_v34, %v735_v37 }
 0x272   : > { %v806_v39 = vmax.f32 %v790_v36, 0.0  ;;  %v918_v36 = vadd.s32 4294967256, %v1511_v23 }
 0x273   : > { %v804_v40 = vmax.f32 %v788_v38, 0.0  ;;  %v744_v41 = vpop.xlane.xlu1 %743  ;;  %v914_v38 = vsub.s32 %v911_v32, %v1514_v26 }
 0x274   : > { %v791_v42 = vadd.f32 %v1107_v34, %v744_v41  ;;  %843 = vperm.xlu1 %1227, %v806_v39   ;;  %v738_v21 = vpop.xlane.xlu0 %737  ;;  %v907_v39 = vsub.s32 %v904_v33, %v1514_v26 }
 0x275   : > { %837 = vperm.xlu0 %1228, %v804_v40   ;;  %v789_v44 = vadd.f32 %v1107_v34, %v738_v21  ;;  %v925_v21 = vadd.s32 4294967248, %v1511_v23 }
 0x276   : > { %v807_v43 = vmax.f32 %v791_v42, 0.0 }
 0x277   : > { %v805_v47 = vmax.f32 %v789_v44, 0.0  ;;  %v921_v44 = vsub.s32 %v918_v36, %v1514_v26 }
 0x278   : > { %846 = vperm.xlu1 %1227, %v807_v43   ;;  %v753_v45 = vpop.xlane.xlu0 %752 }
 0x279   : > { %v756_v46 = vpop.xlane.xlu1 %755  ;;  %v794_v48 = vadd.f32 %v1107_v34, %v753_v45 }
 0x27a   : > { %v795_v55 = vadd.f32 %v1107_v34, %v756_v46 }
 0x27b   : > { %v810_v51 = vmax.f32 %v794_v48, 0.0  ;;  %v932_v48 = vadd.s32 4294967240, %v1511_v23 }
 0x27c   : > { %840 = vperm.xlu1 %1227, %v805_v47   ;;  %v747_v49 = vpop.xlane.xlu0 %746  ;;  %v811_v60 = vmax.f32 %v795_v55, 0.0 }
 0x27d   : > { %v750_v50 = vpop.xlane.xlu1 %749  ;;  %v792_v52 = vadd.f32 %v1107_v34, %v747_v49 }
 0x27e   : > { %v793_v61 = vadd.f32 %v1107_v34, %v750_v50  ;;  %v928_v50 = vsub.s32 %v925_v21, %v1514_v26 }
 0x27f   : > { %v808_v56 = vmax.f32 %v792_v52, 0.0  ;;  %v939_v52 = vadd.s32 4294967232, %v1511_v23 }
 0x280   : > { %855 = vperm.xlu1 %1227, %v810_v51   ;;  %v765_v54 = vpop.xlane.xlu0 %764  ;;  %v809_v1 = vmax.f32 %v793_v61, 0.0 }
 0x281   : > { %v768_v53 = vpop.xlane.xlu1 %767  ;;  %v798_v2 = vadd.f32 %v1107_v34, %v765_v54  ;;  %v946_v54 = vadd.s32 4294967224, %v1511_v23 }
 0x282   : > { %v799_v57 = vadd.f32 %v1107_v34, %v768_v53 }
 0x283   : > { %v814_v7 = vmax.f32 %v798_v2, 0.0 }
 0x284   : > { %v815_v58 = vmax.f32 %v799_v57, 0.0  ;;  %849 = vperm.xlu1 %1227, %v808_v56   ;;  %v759_v63 = vpop.xlane.xlu0 %758  ;;  %v953_v57 = vadd.s32 4294967216, %v1511_v23 }
 0x285   : > { %v762_v59 = vpop.xlane.xlu1 %761  ;;  %v796_v8 = vadd.f32 %v1107_v34, %v759_v63  ;;  %v942_v63 = vsub.s32 %v939_v52, %v1514_v26 }
 0x286   : > { %v797_v62 = vadd.f32 %v1107_v34, %v762_v59  ;;  %870 = vperm.xlu0 %1228, %v815_v58   ;;  %v960_v58 = vadd.s32 4294967208, %v1511_v23  ;;  %v935_v59 = vsub.s32 %v932_v48, %v1514_v26 }
 0x287   : > { %v812_v12 = vmax.f32 %v796_v8, 0.0 }
 0x288   : > { %v813_v0 = vmax.f32 %v797_v62, 0.0  ;;  %858 = vperm.xlu1 %1227, %v811_v60   ;;  %v771_v5 = vpop.xlane.xlu0 %770 }
 0x289   : > { %v800_v13 = vadd.f32 %v1107_v34, %v771_v5 }
 0x28a   : > { %v774_v3 = vpop.xlane.xlu1 %773  ;;  %864 = vperm.xlu0 %1228, %v813_v0   ;;  %v967_v0 = vadd.s32 4294967200, %v1511_v23 }
 0x28b   : > { %v801_v4 = vadd.f32 %v1107_v34, %v774_v3  ;;  %v816_v16 = vmax.f32 %v800_v13, 0.0  ;;  %v956_v3 = vsub.s32 %v953_v57, %v1514_v26  ;;  %v988_v13 = vadd.s32 4294967176, %v1511_v23 }
 0x28c   : > { %852 = vperm.xlu1 %1227, %v809_v1   ;;  %v777_v14 = vpop.xlane.xlu0 %776  ;;  %v949_v1 = vsub.s32 %v946_v54, %v1514_v26 }
 0x28d   : > { %v817_v6 = vmax.f32 %v801_v4, 0.0  ;;  %v802_v17 = vadd.f32 %v1107_v34, %v777_v14  ;;  %v963_v4 = vsub.s32 %v960_v58, %v1514_v26 }
 0x28e   : > { %v780_v9 = vpop.xlane.xlu1 %779 }
 0x28f   : > { %v803_v10 = vadd.f32 %v1107_v34, %v780_v9  ;;  %876 = vperm.xlu0 %1228, %v817_v6   ;;  %v818_v18 = vmax.f32 %v802_v17, 0.0  ;;  %v974_v6 = vadd.s32 4294967192, %v1511_v23 }
 0x290   : > { %867 = vperm.xlu1 %1227, %v814_v7  }
 0x291   : > { %v819_v11 = vmax.f32 %v803_v10, 0.0  ;;  %v970_v10 = vsub.s32 %v967_v0, %v1514_v26 }
 0x293   : > { %882 = vperm.xlu0 %1228, %v819_v11   ;;  %v981_v11 = vadd.s32 4294967184, %v1511_v23  ;;  %v991_v23 = vsub.s32 %v988_v13, %v1514_v26 }
 0x294   : > { %861 = vperm.xlu1 %1227, %v812_v12  }
 0x298   : > { %873 = vperm.xlu1 %1227, %v816_v16  }
 0x29c   : > { %879 = vperm.xlu1 %1227, %v818_v18  }
 0x2f3   : > { %v844_v19 = vpop.permute.xlu1 %843 }
 0x2f4   : > { %v838_v31 = vpop.permute.xlu0 %837  ;;  %v901_v42 = vrot.slane %v844_v19, %v900_v35  ;;  %v977_v19 = vsub.s32 %v974_v6, %v1514_v26 }
 0x2f5   : > { %v889_v37 = vrot.slane %v838_v31, %v888_v30 }
 0x2f7   : > { %v847_v22 = vpop.permute.xlu1 %846 }
 0x2f8   : > { %v908_v47 = vrot.slane %v847_v22, %v907_v39 }
 0x2fb   : > { %v841_v25 = vpop.permute.xlu1 %840 }
 0x2fc   : > { %v894_v15 = vrot.slane %v841_v25, %v893_v27  ;;  %v984_v27 = vsub.s32 %v981_v11, %v1514_v26 }
 0x2fe   : > { %v896_v40 = vsel %vm895_vm5, %v894_v15, %v889_v37 }
 0x2ff   : > { %v856_v28 = vpop.permute.xlu1 %855  ;;  %v903_v45 = vsel %vm902_vm6, %v901_v42, %v896_v40 }
 0x300   : > { %v910_v53 = vsel %vm909_vm7, %v908_v47, %v903_v45  ;;  %v929_v62 = vrot.slane %v856_v28, %v928_v50 }
 0x303   : > { %v850_v34 = vpop.permute.xlu1 %849 }
 0x304   : > { %v915_v46 = vrot.slane %v850_v34, %v914_v38 }
 0x305   : > { %v871_v43 = vpop.permute.xlu0 %870 }
 0x306   : > { %v917_v55 = vsel %vm916_vm8, %v915_v46, %v910_v53  ;;  %v964_v18 = vrot.slane %v871_v43, %v963_v4 }
 0x307   : > { %v859_v41 = vpop.permute.xlu1 %858 }
 0x308   : > { %v936_v5 = vrot.slane %v859_v41, %v935_v59 }
 0x309   : > { %v865_v56 = vpop.permute.xlu0 %864 }
 0x30a   : > { %v950_v12 = vrot.slane %v865_v56, %v949_v1 }
 0x30b   : > { %v853_v49 = vpop.permute.xlu1 %852 }
 0x30c   : > { %v922_v51 = vrot.slane %v853_v49, %v921_v44 }
 0x30e   : > { %v924_v60 = vsel %vm923_vm9, %v922_v51, %v917_v55  ;;  %v877_v8 = vpop.permute.xlu0 %876 }
 0x30f   : > { %v868_v61 = vpop.permute.xlu1 %867  ;;  %v931_v2 = vsel %vm930_vm10, %v929_v62, %v924_v60  ;;  %v978_v31 = vrot.slane %v877_v8, %v977_v19 }
 0x310   : > { %v938_v14 = vsel %vm937_vm11, %v936_v5, %v931_v2  ;;  %v957_v16 = vrot.slane %v868_v61, %v956_v3 }
 0x312   : > { %v883_v29 = vpop.permute.xlu0 %882 }
 0x313   : > { %v862_v7 = vpop.permute.xlu1 %861  ;;  %v992_v15 = vrot.slane %v883_v29, %v991_v23 }
 0x314   : > { %v943_v9 = vrot.slane %v862_v7, %v942_v63 }
 0x316   : > { %v945_v17 = vsel %vm944_vm12, %v943_v9, %v938_v14 }
 0x317   : > { %v952_v20 = vsel %vm951_vm13, %v950_v12, %v945_v17  ;;  %v874_v22 = vpop.permute.xlu1 %873 }
 0x318   : > { %v959_v24 = vsel %vm958_vm14, %v957_v16, %v952_v20  ;;  %v971_v25 = vrot.slane %v874_v22, %v970_v10 }
 0x319   : > { %v966_v28 = vsel %vm965_vm15, %v964_v18, %v959_v24 }
 0x31a   : > { %v973_v30 = vsel %vm972_vm0, %v971_v25, %v966_v28 }
 0x31b   : > { %v880_v32 = vpop.permute.xlu1 %879  ;;  %v980_v34 = vsel %vm979_vm1, %v978_v31, %v973_v30 }
 0x31c   : > { %v985_v33 = vrot.slane %v880_v32, %v984_v27 }
 0x31e   : > { %v987_v35 = vsel %vm986_vm2, %v985_v33, %v980_v34 }
 0x31f   : > { %v994_v26 = vsel %vm993_vm3, %v992_v15, %v987_v35 }
 0x320   : > { %996 = vst [vmem:[%s273_s14] sm:$0x1] %v994_v26 }
 0x321   : > { %1259 = shalt.err (!%p1256_p3)
}
 0x322   : > { %s1260_s18 = scalar_lea.hbm %s1554_s19, 16  ;;  %s1264_s30 = scalar_lea.hbm %s1605_s7, 32 }
 0x323   : > { %p1261_p4 = scmp.ne.s32.totalorder %s1554_s19, %s1260_s18  ;;  %p1265_p9 = scmp.lt.u32.totalorder %s1554_s19, %s1605_s7 }
 0x324   : > { %p1266_p10 = scmp.lt.u32.totalorder %s1264_s30, %s1260_s18  ;;  %p1268_p12 = scmp.lt.u32.totalorder %s1260_s18, %s1554_s19 }
 0x325   : > { %p1262_p7 = pnand %p1261_p4, %p1390_p5 }
 0x326   : > { %p1267_p11 = por %p1266_p10, %p1265_p9 }
 0x327   : > { %p1263_p8 = pneg %p1262_p7 }
 0x328   : > { %p1269_p13 = por %p1268_p12, %p1267_p11 }
 0x32a   : > { %p1270_p0 = pnand %p1269_p13, %p1263_p8 }
 0x32c   : > { %1273 = shalt.err (!%p1270_p0)
}
 0x32d   : > { %1187 = dma.vmem_to_hbm [thread:$0]  (%p1390_p5), %s1556_s15, 16, %s1554_s19, %s998_s20  }
 0x32e PF: > { %p1193_p1 = scmp.ge.s32.totalorder %s1308_s29, 2  ;;  %s1022_s14 = sand.u32 1, %s1296_s26  }
 0x32f   : > { %s1023_s16 = scalar_lea.sflag [#allocation4], %s1022_s14 }
 0x330   : > { %p1190_p2 = pnand %p1193_p1, %p1394_p6 }
 0x332   : > { %1291 = dma.done.wait (!%p1190_p2), %s1023_s16, 16  }
 0x333   : > { %1293 = vsyncadd (!%p1190_p2), %s1023_s16, 4294967280  ;;  %p19_p3 = scmp.ge.s32.totalorder %s1378_s8, 4   ;;  %s1608_s26 = smov %s1300_s27 }
 0x334   : > { %s1609_s27 = smov %s1304_s28  ;;  %s1610_s28 = smov %s1388_s11 }
 0x335   : > { %s1611_s29 = smov %s1378_s8  ;;  %21 = sbr.rel (!%p19_p3) target bundleno = 6 (0x6), region = 83 }
 0x33c   :  { %1027 = vsyncpa [#allocation4], 1 }
 0x33d   :  { %1029 = vsyncpa [#allocation4 + $0x1], 1 }

</bundles_post_ra>
